<compile_context>
chip_gen: v5e
topology: v5e:2x2
jax: 0.10.0
libtpu: 0.0.40
codegen_flags: <defaults>
</compile_context>

<pallas_src>
import functools
import math

import jax
import jax.numpy as jnp
from jax.experimental import pallas as pl
from jax.experimental.pallas import tpu as pltpu

NEG_BIG = -1e30  # finite stand-in for -inf when masking padded softmax lanes


def _round_up(x, m):
    return ((x + m - 1) // m) * m


def _vmem_limit_bytes(blocks):
    """blocks: iterable of (block_shape, dtype). 2x for double buffering."""
    total = 0
    for shape, dtype in blocks:
        total += math.prod(shape) * jnp.dtype(dtype).itemsize
    return int(min(2 * total + (8 << 20), 96 << 20))


# ---------------------------------------------------------------------------
# Kernels
# ---------------------------------------------------------------------------
def _xw_kernel(h_ref, w_ref, o_ref):
    """o_block = H_row_block @ W   (bf16 operands, f32 accumulation)."""
    o_ref[...] = jnp.dot(
        h_ref[...], w_ref[...], preferred_element_type=jnp.float32
    ).astype(o_ref.dtype)


def _agg_kernel(a_ref, xw_ref, b_ref, o_ref, *, act, n_valid_feats):
    """o_block = A_row_block @ XW + b, then LeakyReLU(0.1) or masked softmax."""
    h = jnp.dot(a_ref[...], xw_ref[...],
                preferred_element_type=jnp.float32) + b_ref[...]
    if act == "leaky_relu":
        h = jnp.where(h > 0, h, 0.1 * h)
        o_ref[...] = h.astype(o_ref.dtype)
    else:  # softmax over the feature (lane) axis, masking padded lanes
        lane = jax.lax.broadcasted_iota(jnp.int32, h.shape, dimension=1)
        h = jnp.where(lane < n_valid_feats, h, NEG_BIG)
        m = jnp.max(h, axis=1, keepdims=True)
        e = jnp.exp(h - m)
        s = jnp.sum(e, axis=1, keepdims=True)
        o_ref[...] = (e * pl.reciprocal(s, approx=True)).astype(o_ref.dtype)


# ---------------------------------------------------------------------------
# One GraphConv layer on padded/bf16 operands
# ---------------------------------------------------------------------------
def _gcn_layer(a_p, h_p, w_p, b_p, tm, act, n_valid_feats):
    """a_p: [Np, Np] bf16, h_p: [Np, Fin_p] bf16, w_p: [Fin_p, Fout_p] bf16,
    b_p: [1, Fout_p] f32.  Returns [Np, Fout_p] (bf16 hidden, f32 for softmax)."""
    np_ = a_p.shape[0]
    fin_p = h_p.shape[1]
    fout_p = w_p.shape[1]
    grid = (np_ // tm,)

    # ---- XW = H @ W, row-tiled over nodes (computed once per layer) ----
    xw = pl.pallas_call(
        _xw_kernel,
        out_shape=jax.ShapeDtypeStruct((np_, fout_p), jnp.bfloat16),
        grid=grid,
        in_specs=[pl.BlockSpec((tm, fin_p), lambda i: (i, 0)),
                  pl.BlockSpec((fin_p, fout_p), lambda i: (0, 0))],
        out_specs=pl.BlockSpec((tm, fout_p), lambda i: (i, 0)),
        compiler_params=pltpu.CompilerParams(
            dimension_semantics=("parallel",),
            vmem_limit_bytes=_vmem_limit_bytes(
                [((tm, fin_p), jnp.bfloat16),
                 ((fin_p, fout_p), jnp.bfloat16),
                 ((tm, fout_p), jnp.bfloat16)])),
    )(h_p, w_p)

    # ---- H' = A @ XW + b (+ activation), streaming A in row blocks ----
    out_dtype = jnp.float32 if act == "softmax" else jnp.bfloat16
    out = pl.pallas_call(
        functools.partial(_agg_kernel, act=act, n_valid_feats=n_valid_feats),
        out_shape=jax.ShapeDtypeStruct((np_, fout_p), out_dtype),
        grid=grid,
        in_specs=[pl.BlockSpec((tm, np_), lambda i: (i, 0)),
                  pl.BlockSpec((np_, fout_p), lambda i: (0, 0)),
                  pl.BlockSpec((1, fout_p), lambda i: (0, 0))],
        out_specs=pl.BlockSpec((tm, fout_p), lambda i: (i, 0)),
        compiler_params=pltpu.CompilerParams(
            dimension_semantics=("parallel",),
            vmem_limit_bytes=_vmem_limit_bytes(
                [((tm, np_), jnp.bfloat16),
                 ((np_, fout_p), jnp.bfloat16),
                 ((1, fout_p), jnp.float32),
                 ((tm, fout_p), out_dtype)])),
    )(a_p, xw, b_p)
    return out


# ---------------------------------------------------------------------------
# Full 3-layer forward (matches GCN_3_layers.forward)
# ---------------------------------------------------------------------------
def gcn_3_layers_forward(a_hat, x, params, *, row_tile=256):
    """a_hat: [N, N] symmetrically normalized adjacency; x: [N, in_feats]."""
    (w1, b1), (w2, b2), (w3, b3) = params
    n = x.shape[0]
    f_in, h1 = w1.shape
    _, h2 = w2.shape
    _, f_out = w3.shape

    # Lane-dense feature padding (multiples of 128).
    fin_p = _round_up(f_in, 128)
    h1_p = _round_up(h1, 128)
    h2_p = _round_up(h2, 128)
    fout_p = _round_up(f_out, 128)

    # Node padding (sublane multiple of 8) + row tile for streaming A.
    np_ = _round_up(n, 8)
    if np_ > row_tile:
        tm = row_tile
        np_ = _round_up(np_, tm)
    else:
        tm = np_

    def pad2(a, r, c):
        return jnp.pad(a, ((0, r - a.shape[0]), (0, c - a.shape[1])))

    a_p = pad2(a_hat.astype(jnp.float32), np_, np_).astype(jnp.bfloat16)
    x_p = pad2(x.astype(jnp.float32), np_, fin_p).astype(jnp.bfloat16)

    w1_p = pad2(w1.astype(jnp.float32), fin_p, h1_p).astype(jnp.bfloat16)
    w2_p = pad2(w2.astype(jnp.float32), h1_p, h2_p).astype(jnp.bfloat16)
    w3_p = pad2(w3.astype(jnp.float32), h2_p, fout_p).astype(jnp.bfloat16)
    b1_p = pad2(b1.reshape(1, -1).astype(jnp.float32), 1, h1_p)
    b2_p = pad2(b2.reshape(1, -1).astype(jnp.float32), 1, h2_p)
    b3_p = pad2(b3.reshape(1, -1).astype(jnp.float32), 1, fout_p)

    h = _gcn_layer(a_p, x_p, w1_p, b1_p, tm, "leaky_relu", h1)
    h = _gcn_layer(a_p, h, w2_p, b2_p, tm, "leaky_relu", h2)
    h = _gcn_layer(a_p, h, w3_p, b3_p, tm, "softmax", f_out)

    return h[:n, :f_out]


# ---------------------------------------------------------------------------
# Parameter / graph construction helpers
# ---------------------------------------------------------------------------
def make_params(key, in_feats, h1, h2, out):
    """Glorot-uniform weights + zero biases (GraphConv default)."""
    def glorot(k, fan_in, fan_out):
        lim = jnp.sqrt(6.0 / (fan_in + fan_out))
        return jax.random.uniform(k, (fan_in, fan_out), jnp.float32, -lim, lim)

    k1, k2, k3 = jax.random.split(key, 3)
    return ((glorot(k1, in_feats, h1), jnp.zeros((1, h1), jnp.float32)),
            (glorot(k2, h1, h2), jnp.zeros((1, h2), jnp.float32)),
            (glorot(k3, h2, out), jnp.zeros((1, out), jnp.float32)))


def normalized_adjacency(adj):
    """A_hat = D^-1/2 (A + I) D^-1/2 (GraphConv norm='both' with self-loops)."""
    n = adj.shape[0]
    a = adj + jnp.eye(n, dtype=jnp.float32)
    deg = jnp.clip(a.sum(axis=1), 1.0, None)
    d_inv_sqrt = 1.0 / jnp.sqrt(deg)
    return d_inv_sqrt[:, None] * a * d_inv_sqrt[None, :]


if __name__ == "__main__":
    # Small synthetic problem: 8-node graph, in_feats=16, hidden=32/32, out=8.
    N, IN_FEATS, H1, H2, OUT = 8, 16, 32, 32, 8

    key = jax.random.PRNGKey(0)
    k_adj, k_x, k_p = jax.random.split(key, 3)

    raw = jax.random.bernoulli(k_adj, 0.4, (N, N)).astype(jnp.float32)
    adj = jnp.clip(raw + raw.T, 0.0, 1.0) * (1.0 - jnp.eye(N, dtype=jnp.float32))
    a_hat = normalized_adjacency(adj)

    x = jax.random.normal(k_x, (N, IN_FEATS), jnp.float32)
    params = make_params(k_p, IN_FEATS, H1, H2, OUT)

    fwd = jax.jit(gcn_3_layers_forward)
    out = fwd(a_hat, x, params)
    jax.block_until_ready(out)

    # Pure-JAX f32 reference of the same math.
    def ref(a, xx, ps):
        (w1, b1), (w2, b2), (w3, b3) = ps
        h = a @ (xx @ w1) + b1
        h = jnp.where(h > 0, h, 0.1 * h)
        h = a @ (h @ w2) + b2
        h = jnp.where(h > 0, h, 0.1 * h)
        h = a @ (h @ w3) + b3
        return jax.nn.softmax(h, axis=1)

    ref_out = ref(a_hat, x, params)
    assert out.shape == (N, OUT)
    # Tolerances account for bf16 operands and approx EUP reciprocal.
    assert jnp.allclose(out, ref_out, atol=3e-2, rtol=3e-2)
    assert jnp.allclose(out.sum(axis=1), 1.0, atol=1e-2)

    print("KERNEL_OK")
</pallas_src>

<mosaic_0001>
module attributes {stable_mosaic.version = 11 : i64} {
  func.func @_xw_kernel(%arg0: i32, %arg1: memref<8x128xbf16, #tpu.memory_space<vmem>>, %arg2: memref<128x128xbf16, #tpu.memory_space<vmem>>, %arg3: memref<8x128xbf16, #tpu.memory_space<vmem>>) attributes {dimension_semantics = [#tpu.dimension_semantics<parallel>], iteration_bounds = array<i64: 1>, scalar_prefetch = 0 : i64, scratch_operands = 0 : i64, tpu.core_type = #tpu.core_type<tc>, window_params = [{transform_indices = @transform_0, window_bounds = array<i64: 8, 128>}, {pipeline_mode = #tpu.pipeline_mode<synchronous>, transform_indices = @transform_1, window_bounds = array<i64: 128, 128>}, {transform_indices = @transform_2, window_bounds = array<i64: 8, 128>}]} {
    %c0 = arith.constant 0 : index
    %c0_0 = arith.constant 0 : index
    %0 = vector.load %arg1[%c0, %c0_0] : memref<8x128xbf16, #tpu.memory_space<vmem>>, vector<8x128xbf16>
    %c0_1 = arith.constant 0 : index
    %c0_2 = arith.constant 0 : index
    %1 = vector.load %arg2[%c0_1, %c0_2] : memref<128x128xbf16, #tpu.memory_space<vmem>>, vector<128x128xbf16>
    %cst = arith.constant dense<0.000000e+00> : vector<8x128xf32>
    %2 = tpu.matmul %0, %1, %cst {dimension_numbers = #tpu.dot_dimension_numbers<[1], [0], [0], [1], [0, 0, 1, 1], [], []>} : vector<8x128xbf16>, vector<128x128xbf16>, vector<8x128xf32> -> vector<8x128xf32>
    %3 = arith.truncf %2 : vector<8x128xf32> to vector<8x128xbf16>
    %c0_3 = arith.constant 0 : index
    %c0_4 = arith.constant 0 : index
    %4 = vector.load %arg3[%c0_3, %c0_4] : memref<8x128xbf16, #tpu.memory_space<vmem>>, vector<8x128xbf16>
    tpu.vector_store %arg3[%c0_3, %c0_4], %3 {strides = array<i32>} : memref<8x128xbf16, #tpu.memory_space<vmem>>, vector<8x128xbf16>,
    return
  }
  func.func @transform_0(%arg0: i32) -> (i32, i32) {
    %c0_i32 = arith.constant 0 : i32
    %c0_i32_0 = arith.constant 0 : i32
    return %arg0, %c0_i32 : i32, i32
  }
  func.func @transform_1(%arg0: i32) -> (i32, i32) {
    %c0_i32 = arith.constant 0 : i32
    %c0_i32_0 = arith.constant 0 : i32
    %c0_i32_1 = arith.constant 0 : i32
    return %c0_i32, %c0_i32_0 : i32, i32
  }
  func.func @transform_2(%arg0: i32) -> (i32, i32) {
    %c0_i32 = arith.constant 0 : i32
    %c0_i32_0 = arith.constant 0 : i32
    return %arg0, %c0_i32 : i32, i32
  }
}

module attributes {stable_mosaic.version = 11 : i64} {
  func.func @_agg_kernel(%arg0: i32, %arg1: memref<8x8xbf16, #tpu.memory_space<vmem>>, %arg2: memref<8x128xbf16, #tpu.memory_space<vmem>>, %arg3: memref<1x128xf32, #tpu.memory_space<vmem>>, %arg4: memref<8x128xbf16, #tpu.memory_space<vmem>>) attributes {dimension_semantics = [#tpu.dimension_semantics<parallel>], iteration_bounds = array<i64: 1>, scalar_prefetch = 0 : i64, scratch_operands = 0 : i64, tpu.core_type = #tpu.core_type<tc>, window_params = [{transform_indices = @transform_0, window_bounds = array<i64: 8, 8>}, {pipeline_mode = #tpu.pipeline_mode<synchronous>, transform_indices = @transform_1, window_bounds = array<i64: 8, 128>}, {pipeline_mode = #tpu.pipeline_mode<synchronous>, transform_indices = @transform_2, window_bounds = array<i64: 1, 128>}, {transform_indices = @transform_3, window_bounds = array<i64: 8, 128>}]} {
    %c0 = arith.constant 0 : index
    %c0_0 = arith.constant 0 : index
    %0 = vector.load %arg1[%c0, %c0_0] : memref<8x8xbf16, #tpu.memory_space<vmem>>, vector<8x8xbf16>
    %c0_1 = arith.constant 0 : index
    %c0_2 = arith.constant 0 : index
    %1 = vector.load %arg2[%c0_1, %c0_2] : memref<8x128xbf16, #tpu.memory_space<vmem>>, vector<8x128xbf16>
    %cst = arith.constant dense<0.000000e+00> : vector<8x128xf32>
    %2 = tpu.matmul %0, %1, %cst {dimension_numbers = #tpu.dot_dimension_numbers<[1], [0], [0], [1], [0, 0, 1, 1], [], []>} : vector<8x8xbf16>, vector<8x128xbf16>, vector<8x128xf32> -> vector<8x128xf32>
    %c0_3 = arith.constant 0 : index
    %c0_4 = arith.constant 0 : index
    %3 = vector.load %arg3[%c0_3, %c0_4] : memref<1x128xf32, #tpu.memory_space<vmem>>, vector<1x128xf32>
    %4 = vector.broadcast %3 : vector<1x128xf32> to vector<8x128xf32>
    %5 = arith.addf %2, %4 : vector<8x128xf32>
    %cst_5 = arith.constant 0.000000e+00 : f32
    %6 = vector.broadcast %cst_5 : f32 to vector<8x128xf32>
    %7 = arith.cmpf ogt, %5, %6 : vector<8x128xf32>
    %cst_6 = arith.constant 1.000000e-01 : f32
    %8 = vector.broadcast %cst_6 : f32 to vector<8x128xf32>
    %9 = arith.mulf %8, %5 : vector<8x128xf32>
    %10 = arith.select %7, %5, %9 : vector<8x128xi1>, vector<8x128xf32>
    %11 = arith.truncf %10 : vector<8x128xf32> to vector<8x128xbf16>
    %c0_7 = arith.constant 0 : index
    %c0_8 = arith.constant 0 : index
    %12 = vector.load %arg4[%c0_7, %c0_8] : memref<8x128xbf16, #tpu.memory_space<vmem>>, vector<8x128xbf16>
    tpu.vector_store %arg4[%c0_7, %c0_8], %11 {strides = array<i32>} : memref<8x128xbf16, #tpu.memory_space<vmem>>, vector<8x128xbf16>,
    return
  }
  func.func @transform_0(%arg0: i32) -> (i32, i32) {
    %c0_i32 = arith.constant 0 : i32
    %c0_i32_0 = arith.constant 0 : i32
    return %arg0, %c0_i32 : i32, i32
  }
  func.func @transform_1(%arg0: i32) -> (i32, i32) {
    %c0_i32 = arith.constant 0 : i32
    %c0_i32_0 = arith.constant 0 : i32
    %c0_i32_1 = arith.constant 0 : i32
    return %c0_i32, %c0_i32_0 : i32, i32
  }
  func.func @transform_2(%arg0: i32) -> (i32, i32) {
    %c0_i32 = arith.constant 0 : i32
    %c0_i32_0 = arith.constant 0 : i32
    %c0_i32_1 = arith.constant 0 : i32
    return %c0_i32, %c0_i32_0 : i32, i32
  }
  func.func @transform_3(%arg0: i32) -> (i32, i32) {
    %c0_i32 = arith.constant 0 : i32
    %c0_i32_0 = arith.constant 0 : i32
    return %arg0, %c0_i32 : i32, i32
  }
}

module attributes {stable_mosaic.version = 11 : i64} {
  func.func @_agg_kernel(%arg0: i32, %arg1: memref<8x8xbf16, #tpu.memory_space<vmem>>, %arg2: memref<8x128xbf16, #tpu.memory_space<vmem>>, %arg3: memref<1x128xf32, #tpu.memory_space<vmem>>, %arg4: memref<8x128xf32, #tpu.memory_space<vmem>>) attributes {dimension_semantics = [#tpu.dimension_semantics<parallel>], iteration_bounds = array<i64: 1>, scalar_prefetch = 0 : i64, scratch_operands = 0 : i64, tpu.core_type = #tpu.core_type<tc>, window_params = [{transform_indices = @transform_0, window_bounds = array<i64: 8, 8>}, {pipeline_mode = #tpu.pipeline_mode<synchronous>, transform_indices = @transform_1, window_bounds = array<i64: 8, 128>}, {pipeline_mode = #tpu.pipeline_mode<synchronous>, transform_indices = @transform_2, window_bounds = array<i64: 1, 128>}, {transform_indices = @transform_3, window_bounds = array<i64: 8, 128>}]} {
    %c0 = arith.constant 0 : index
    %c0_0 = arith.constant 0 : index
    %0 = vector.load %arg1[%c0, %c0_0] : memref<8x8xbf16, #tpu.memory_space<vmem>>, vector<8x8xbf16>
    %c0_1 = arith.constant 0 : index
    %c0_2 = arith.constant 0 : index
    %1 = vector.load %arg2[%c0_1, %c0_2] : memref<8x128xbf16, #tpu.memory_space<vmem>>, vector<8x128xbf16>
    %cst = arith.constant dense<0.000000e+00> : vector<8x128xf32>
    %2 = tpu.matmul %0, %1, %cst {dimension_numbers = #tpu.dot_dimension_numbers<[1], [0], [0], [1], [0, 0, 1, 1], [], []>} : vector<8x8xbf16>, vector<8x128xbf16>, vector<8x128xf32> -> vector<8x128xf32>
    %c0_3 = arith.constant 0 : index
    %c0_4 = arith.constant 0 : index
    %3 = vector.load %arg3[%c0_3, %c0_4] : memref<1x128xf32, #tpu.memory_space<vmem>>, vector<1x128xf32>
    %4 = vector.broadcast %3 : vector<1x128xf32> to vector<8x128xf32>
    %5 = arith.addf %2, %4 : vector<8x128xf32>
    %6 = tpu.iota {dimensions = array<i32: 1>} : vector<8x128xi32>
    %c8_i32 = arith.constant 8 : i32
    %7 = vector.broadcast %c8_i32 : i32 to vector<8x128xi32>
    %8 = arith.cmpi slt, %6, %7 : vector<8x128xi32>
    %cst_5 = arith.constant -1.000000e+30 : f32
    %9 = vector.broadcast %cst_5 : f32 to vector<8x128xf32>
    %10 = arith.select %8, %5, %9 : vector<8x128xi1>, vector<8x128xf32>
    %cst_6 = arith.constant dense<0xFF800000> : vector<8xf32>
    %11 = vector.multi_reduction <maximumf>, %10, %cst_6 [1] : vector<8x128xf32> to vector<8xf32>
    %12 = vector.shape_cast %11 : vector<8xf32> to vector<8x1xf32>
    %13 = vector.broadcast %12 : vector<8x1xf32> to vector<8x128xf32>
    %14 = arith.subf %10, %13 : vector<8x128xf32>
    %15 = math.exp %14 : vector<8x128xf32>
    %cst_7 = arith.constant dense<0.000000e+00> : vector<8xf32>
    %16 = vector.multi_reduction <add>, %15, %cst_7 [1] : vector<8x128xf32> to vector<8xf32>
    %17 = vector.shape_cast %16 : vector<8xf32> to vector<8x1xf32>
    %18 = tpu.reciprocal %17 {approx = true} : vector<8x1xf32> -> vector<8x1xf32>
    %19 = vector.broadcast %18 : vector<8x1xf32> to vector<8x128xf32>
    %20 = arith.mulf %15, %19 : vector<8x128xf32>
    %c0_8 = arith.constant 0 : index
    %c0_9 = arith.constant 0 : index
    %21 = vector.load %arg4[%c0_8, %c0_9] : memref<8x128xf32, #tpu.memory_space<vmem>>, vector<8x128xf32>
    tpu.vector_store %arg4[%c0_8, %c0_9], %20 {strides = array<i32>} : memref<8x128xf32, #tpu.memory_space<vmem>>, vector<8x128xf32>,
    return
  }
  func.func @transform_0(%arg0: i32) -> (i32, i32) {
    %c0_i32 = arith.constant 0 : i32
    %c0_i32_0 = arith.constant 0 : i32
    return %arg0, %c0_i32 : i32, i32
  }
  func.func @transform_1(%arg0: i32) -> (i32, i32) {
    %c0_i32 = arith.constant 0 : i32
    %c0_i32_0 = arith.constant 0 : i32
    %c0_i32_1 = arith.constant 0 : i32
    return %c0_i32, %c0_i32_0 : i32, i32
  }
  func.func @transform_2(%arg0: i32) -> (i32, i32) {
    %c0_i32 = arith.constant 0 : i32
    %c0_i32_0 = arith.constant 0 : i32
    %c0_i32_1 = arith.constant 0 : i32
    return %c0_i32, %c0_i32_0 : i32, i32
  }
  func.func @transform_3(%arg0: i32) -> (i32, i32) {
    %c0_i32 = arith.constant 0 : i32
    %c0_i32_0 = arith.constant 0 : i32
    return %arg0, %c0_i32 : i32, i32
  }
}

</mosaic_0001>

<bundles_post_ra>
// kernel: gcn_3_layers_forward.6
= control target key start
LH: loop header
LB: loop body
LE: loop exit
PB: predicated region body
PF: predicated region fallthrough
CT: control target
= control target key end

     0   :  { %s180_s1 = inlined_call_operand.vmem [shape: bf16[128,128], index: 1, kind: input, shape index: {}]   ;;  %s181_s0 = inlined_call_operand.vmem [shape: bf16[8,128], index: 0, kind: input, shape index: {}]   ;;  %s182_s2 = inlined_call_operand.vmem [shape: bf16[8,128], index: 2, kind: output, shape index: {}]  }
   0x1   :  { %v134_v0 = vld [vmem:[%s180_s1 + $0x38] sm:$0xff]  ;;  %v133_v1 = vld [vmem:[%s180_s1 + $0x30] sm:$0xff]  ;;  %v132_v2 = vld [vmem:[%s180_s1 + $0x28] sm:$0xff] }
   0x2   :  { %76 = vmatpush.bf16.msra.mxu0 %v134_v0  ;;  %v131_v3 = vld [vmem:[%s180_s1 + $0x20] sm:$0xff]  ;;  %v130_v4 = vld [vmem:[%s180_s1 + $0x18] sm:$0xff]  ;;  %v129_v5 = vld [vmem:[%s180_s1 + $0x10] sm:$0xff] }
   0x3   :  { %v128_v6 = vld [vmem:[%s180_s1 + $0x8] sm:$0xff]  ;;  %v127_v7 = vld [vmem:[%s180_s1] sm:$0xff] }
   0x4   :  { %v11_v8 = vld [vmem:[%s181_s0] sm:$0xf] }
   0x6   :  { %77 = vmatpush.bf16.msra.mxu0 %v133_v1 }
   0xa   :  { %78 = vmatpush.bf16.msra.mxu0 %v132_v2 }
   0xe   :  { %79 = vmatpush.bf16.msra.mxu0 %v131_v3 }
  0x12   :  { %80 = vmatpush.bf16.msra.mxu0 %v130_v4 }
  0x16   :  { %81 = vmatpush.bf16.msra.mxu0 %v129_v5 }
  0x1a   :  { %82 = vmatpush.bf16.msra.mxu0 %v128_v6 }
  0x1e   :  { %83 = vmatpush.bf16.msra.mxu0 %v127_v7 }
  0x21   :  { %84 = vmatmul.bf16.vlgmr.msra.gmra.mxu0 %v11_v8 }
  0x9e   :  { %v85_v9 = vpop.f32.mrf.mxu0 }
  0x9f   :  { %v89_v10 = vpack.c.bf16 %v85_v9, %v85_v9 }
  0xa1   :  { %90 = vst [vmem:[%s182_s2] sm:$0xf] %v89_v10 }
  0xa6   :  { %v87_v11 = vpop.f32.mrf.mxu0 }

// kernel: gcn_3_layers_forward.7
= control target key start
LH: loop header
LB: loop body
LE: loop exit
PB: predicated region body
PF: predicated region fallthrough
CT: control target
= control target key end

     0   :  { %vm25_vm0 = vcmask 1043456   ;;  %vm21_vm1 = vcmask 64512   ;;  %s85_s1 = inlined_call_operand.vmem [shape: bf16[8,128], index: 1, kind: input, shape index: {}]   ;;  %s86_s0 = inlined_call_operand.vmem [shape: bf16[8,8], index: 0, kind: input, shape index: {}]   ;;  %s87_s2 = inlined_call_operand.vmem [shape: f32[1,128], index: 2, kind: input, shape index: {}]   ;;  %s88_s3 = inlined_call_operand.vmem [shape: bf16[8,128], index: 3, kind: output, shape index: {}]  }
   0x1   :  { %v16_v0 = vld [vmem:[%s85_s1] sm:$0xf] }
   0x2   :  { %v27_v1 = vsel %vm25_vm0, %v16_v0, 0  ;;  %v15_v2 = vld [vmem:[%s86_s0] sm:$0xf] }
   0x3   :  { %36 = vmatpush.bf16.msra.mxu0 %v27_v1  ;;  %v52_v3 = vld [vmem:[%s87_s2] ss:$0 sm:$0xff] }
   0x6   :  { %51 = vmatmul.msk.bf16.vlgmr.msra.gmra.mxu0 %vm21_vm1, %v15_v2 }
  0x83   :  { %v38_v4 = vpop.f32.mrf.mxu0 }
  0x84   :  { %v39_v5 = vadd.f32 %v52_v3, %v38_v4 }
  0x86   :  { %vm42_vm2 = vcmp.gt.f32.partialorder %v39_v5, 0.0  ;;  %v43_v6 = vmul.f32 0.1, %v39_v5 }
  0x88   :  { %v44_v7 = vsel %vm42_vm2, %v39_v5, %v43_v6 }
  0x89   :  { %v45_v8 = vpack.c.bf16 %v44_v7, %v44_v7 }
  0x8b   :  { %46 = vst [vmem:[%s88_s3] sm:$0xf] %v45_v8  ;;  %v40_v9 = vpop.f32.mrf.mxu0 }

// kernel: gcn_3_layers_forward.11
= control target key start
LH: loop header
LB: loop body
LE: loop exit
PB: predicated region body
PF: predicated region fallthrough
CT: control target
= control target key end

     0   :  { %vm26_vm0 = vcmask 1043456   ;;  %vm22_vm1 = vcmask 64512   ;;  %s139_s0 = inlined_call_operand.vmem [shape: bf16[8,8], index: 0, kind: input, shape index: {}]   ;;  %s140_s1 = inlined_call_operand.vmem [shape: bf16[8,128], index: 1, kind: input, shape index: {}]   ;;  %s141_s2 = inlined_call_operand.vmem [shape: f32[1,128], index: 2, kind: input, shape index: {}]   ;;  %s142_s3 = inlined_call_operand.hbm [shape: f32[8,128], index: 3, kind: output, shape index: {}]  }
   0x1   :  { %v17_v0 = vld [vmem:[%s140_s1] sm:$0xf] }
   0x2   :  { %v28_v1 = vsel %vm26_vm0, %v17_v0, 0  ;;  %v16_v2 = vld [vmem:[%s139_s0] sm:$0xf] }
   0x3   :  { %37 = vmatpush.bf16.msra.mxu0 %v28_v1 }
   0x4   :  { %8 = vsyncpa [#allocation3], 0  ;;  %v43_v3 = vlaneseq  ;;  %v75_v5 = vld [vmem:[%s141_s2] ss:$0 sm:$0xff]  ;;  %s106_s0 = smov [#allocation2]   ;;  %s64_s2 = sshll.u32 %s142_s3, 4  ;;  %s65_s2 = int_to_ptr.hbm [resolvable:$true] %s64_s2 }
   0x5   :  { %s62_s1 = sshll.u32 %s106_s0, 4  ;;  %s63_s1 = int_to_ptr.vmem [resolvable:$true] %s62_s1 }
   0x6   :  { %73 = vmatmul.msk.bf16.vlgmr.msra.gmra.mxu0 %vm22_vm1, %v16_v2  ;;  %v44_v4 = vand.u32 127, %v43_v3 }
   0x8   :  { %vm45_vm2 = vcmp.lt.s32.totalorder %v44_v4, 8 }
  0x83   :  { %v39_v6 = vpop.f32.mrf.mxu0 }
  0x84   :  { %v40_v7 = vadd.f32 %v75_v5, %v39_v6 }
  0x86   :  { %v46_v8 = vsel %vm45_vm2, %v40_v7, -1e+30 }
  0x87   :  { %47 = vmax.xlane.f32.xlu0 %v46_v8 }
  0x8b   :  { %v41_v9 = vpop.f32.mrf.mxu0 }
  0xfa   :  { %v48_v10 = vpop.xlane.xlu0 %47 }
  0xfb   :  { %v49_v11 = vsub.f32 %v46_v8, %v48_v10 }
  0xfd   :  { %v50_v12 = vmul.f32 1.442695, %v49_v11 }
  0xff   :  { %76 = vpow2.f32 %v50_v12 }
 0x105   :  { %v77_v13 = vpop.eup %76 }
 0x106   :  { %52 = vadd.xlane.f32.xlu0 %v77_v13 }
 0x179   :  { %v53_v14 = vpop.xlane.xlu0 %52 }
 0x17a   :  { %78 = vrcp.f32 %v53_v14 }
 0x180   :  { %v79_v15 = vpop.eup %78 }
 0x181   :  { %v55_v16 = vmul.f32 %v79_v15, %v77_v13 }
 0x183   :  { %56 = vst [vmem:[#allocation2] sm:$0xff] %v55_v16 }
 0x184   :  { %67 = dma.vmem_to_hbm [thread:$0]  %s63_s1, 128, %s65_s2, [#allocation3]  }
 0x185   :  { %104 = dma.done.wait [#allocation3], 128  }
 0x186   :  { %105 = vsyncadd [#allocation3], 4294967168 }
 0x187   :  { %72 = vsyncpa [#allocation3], 1 }

</bundles_post_ra>
